<compile_context>
chip_gen: v7x
topology: tpu7x:2x2x1
jax: 0.10.0
libtpu: 0.0.40
codegen_flags: <defaults>
</compile_context>

<pallas_src>
import functools

import jax
import jax.numpy as jnp
from jax.experimental import pallas as pl
from jax.experimental.pallas import tpu as pltpu

LANE = 128


def _round_up(x, m):
    return ((x + m - 1) // m) * m


def _pick_tile(n, candidates):
    for c in candidates:
        if n % c == 0:
            return c
    return n


def _pad2(a, rows, cols, dtype=None):
    r, c = a.shape
    out = jnp.pad(a, ((0, rows - r), (0, cols - c)))
    return out.astype(dtype) if dtype is not None else out


# --------------------------------------------------------------------------
# Projection kernel:  O = X @ W   (small dense projection, hoisted out of the
# A-tiled aggregation loop; weights stay resident via constant index_map).
# bf16 inputs, f32 MXU accumulate.
# --------------------------------------------------------------------------
def _project_kernel(x_ref, w_ref, o_ref):
    o_ref[...] = jnp.dot(
        x_ref[...], w_ref[...], preferred_element_type=jnp.float32
    ).astype(o_ref.dtype)


def _project(x, w, out_dtype=jnp.bfloat16):
    n, f = x.shape
    _, p = w.shape
    tm = _pick_tile(n, (512, 256, 128))
    return pl.pallas_call(
        _project_kernel,
        out_shape=jax.ShapeDtypeStruct((n, p), out_dtype),
        grid_spec=pltpu.PrefetchScalarGridSpec(
            num_scalar_prefetch=0,
            grid=(n // tm,),
            in_specs=[
                pl.BlockSpec((tm, f), lambda i: (i, 0)),
                pl.BlockSpec((f, p), lambda i: (0, 0)),   # resident weights
            ],
            out_specs=pl.BlockSpec((tm, p), lambda i: (i, 0)),
        ),
        compiler_params=pltpu.CompilerParams(
            dimension_semantics=("parallel",)),
        cost_estimate=pl.CostEstimate(
            flops=2 * n * f * p,
            transcendentals=0,
            bytes_accessed=int(n * f * x.dtype.itemsize
                               + f * p * w.dtype.itemsize
                               + n * p * jnp.dtype(out_dtype).itemsize)),
    )(x, w)


# --------------------------------------------------------------------------
# Aggregation kernels.
#   Fused variant   :  O = (relu(A @ RHS + b1)) @ W2        (bf16 out)
#   Plain variant   :  O = A @ RHS + b                      (f32 out,
#                       accumulated directly into the resident output block)
# Grid = (row tiles, reduction tiles); reduction last, marked "arbitrary".
# --------------------------------------------------------------------------
def _agg_fused_kernel(a_ref, r_ref, b1_ref, w2_ref, o_ref, acc_ref, *,
                      tk, resident_rhs):
    k = pl.program_id(1)

    @pl.when(k == 0)
    def _():
        acc_ref[...] = jnp.zeros_like(acc_ref)

    if resident_rhs:
        off = pl.multiple_of(k * tk, tk)
        r = r_ref[pl.ds(off, tk), :]
    else:
        r = r_ref[...]
    acc_ref[...] += jnp.dot(a_ref[...], r, preferred_element_type=jnp.float32)

    @pl.when(k == pl.num_programs(1) - 1)
    def _():
        h = jnp.maximum(acc_ref[...] + b1_ref[...], 0.0).astype(w2_ref.dtype)
        o_ref[...] = jnp.dot(
            h, w2_ref[...], preferred_element_type=jnp.float32
        ).astype(o_ref.dtype)


def _agg_bias_kernel(a_ref, r_ref, b_ref, o_ref, *, tk, resident_rhs,
                     apply_relu):
    k = pl.program_id(1)

    @pl.when(k == 0)
    def _():
        o_ref[...] = jnp.zeros_like(o_ref)

    if resident_rhs:
        off = pl.multiple_of(k * tk, tk)
        r = r_ref[pl.ds(off, tk), :]
    else:
        r = r_ref[...]
    # Output block index is constant across k -> o_ref is resident; accumulate
    # directly into it (f32), no scratch needed.
    o_ref[...] += jnp.dot(a_ref[...], r, preferred_element_type=jnp.float32)

    @pl.when(k == pl.num_programs(1) - 1)
    def _():
        res = o_ref[...] + b_ref[...]
        if apply_relu:
            res = jnp.maximum(res, 0.0)
        o_ref[...] = res


def _aggregate(a, rhs, bias, *, w2=None, apply_relu=False,
               out_dtype=jnp.float32):
    """O = A @ rhs + bias  (+ReLU)  [optionally  @ W2  fused in the epilogue]."""
    n = a.shape[0]
    p = rhs.shape[1]                              # accumulation width
    fused = w2 is not None
    p_out = w2.shape[1] if fused else p

    a_b = a.dtype.itemsize
    r_b = rhs.dtype.itemsize
    o_b = jnp.dtype(out_dtype).itemsize

    # Conservative VMEM budget (fits v7x's 64 MiB with headroom for compiler
    # internal scratch; v5e/v6e have 128 MiB so this is always safe).
    budget = 40 * 1024 * 1024

    tm_cands = [t for t in (1024, 512, 256, 128) if t <= n and n % t == 0]
    tk_cands = [t for t in (2048, 1024, 512, 256, 128) if t <= n and n % t == 0]

    def footprint(tm, tk, resident):
        need = 2 * tm * tk * a_b                                   # A tiles
        need += (2 * n * p * r_b) if resident else (2 * tk * p * r_b)  # RHS
        need += 2 * tm * p_out * o_b                               # out tiles
        need += 2 * bias.shape[1] * bias.dtype.itemsize            # bias
        if fused:
            need += 2 * w2.shape[0] * w2.shape[1] * w2.dtype.itemsize
            need += tm * p * 4                                     # acc scratch
        return need

    def pick_plan():
        # Prefer a resident RHS (loaded once -> no per-row-tile re-stream) and
        # the largest tiles that stay inside the budget.
        for resident in (True, False):
            for tm in tm_cands:
                for tk in tk_cands:
                    if footprint(tm, tk, resident) <= budget:
                        return tm, tk, resident
        return tm_cands[-1], tk_cands[-1], False

    tm, tk, resident = pick_plan()
    need = footprint(tm, tk, resident)
    # Explicitly above the 16/32 MiB scoped defaults, capped below v7x's 64 MiB.
    vmem_limit = int(min(48 * 1024 * 1024,
                         max(24 * 1024 * 1024, int(1.5 * need))))

    if resident:
        rhs_spec = pl.BlockSpec((n, p), lambda i, k: (0, 0))       # resident slab
    else:
        rhs_spec = pl.BlockSpec((tk, p), lambda i, k: (k, 0))      # streamed slab

    in_specs = [
        pl.BlockSpec((tm, tk), lambda i, k: (i, k)),               # A tile
        rhs_spec,
        pl.BlockSpec((1, bias.shape[1]), lambda i, k: (0, 0)),     # bias
    ]
    operands = [a, rhs, bias]

    if fused:
        in_specs.append(pl.BlockSpec(w2.shape, lambda i, k: (0, 0)))  # W2 resident
        operands.append(w2)
        scratch = [pltpu.VMEM((tm, p), jnp.float32)]
        kernel = functools.partial(_agg_fused_kernel, tk=tk,
                                   resident_rhs=resident)
    else:
        scratch = []
        kernel = functools.partial(_agg_bias_kernel, tk=tk,
                                   resident_rhs=resident,
                                   apply_relu=apply_relu)

    flops = 2 * n * n * p + (2 * n * p * p_out if fused else 0)
    bytes_acc = (n * n * a_b + n * p * r_b + n * p_out * o_b
                 + (w2.size * w2.dtype.itemsize if fused else 0))

    return pl.pallas_call(
        kernel,
        out_shape=jax.ShapeDtypeStruct((n, p_out), out_dtype),
        grid_spec=pltpu.PrefetchScalarGridSpec(
            num_scalar_prefetch=0,
            grid=(n // tm, n // tk),
            in_specs=in_specs,
            out_specs=pl.BlockSpec((tm, p_out), lambda i, k: (i, 0)),
            scratch_shapes=scratch,
        ),
        compiler_params=pltpu.CompilerParams(
            dimension_semantics=("parallel", "arbitrary"),
            vmem_limit_bytes=vmem_limit),
        cost_estimate=pl.CostEstimate(
            flops=int(flops), transcendentals=0,
            bytes_accessed=int(bytes_acc)),
    )(*operands)


# --------------------------------------------------------------------------
# Full forward pass.
# --------------------------------------------------------------------------
def gcn_forward(a_norm, x, w1, b1, w2, b2):
    n, f = x.shape
    h = w1.shape[1]
    c = w2.shape[1]

    n_pad = _round_up(n, LANE)
    h_pad = _round_up(h, LANE)
    c_pad = _round_up(c, LANE)

    # Lane-dense, tile-aligned zero padding (numerically inert: padded A
    # rows/cols are zero, padded W/b columns are zero; result sliced below).
    # bf16 inputs so the MXU runs its native datatype; accumulation stays f32.
    a_p = _pad2(a_norm, n_pad, n_pad, jnp.bfloat16)   # A in [0, 1]
    x_p = _pad2(x, n_pad, f, jnp.bfloat16)
    w1_p = _pad2(w1, f, h_pad, jnp.bfloat16)
    b1_p = _pad2(b1, 1, h_pad, jnp.float32)
    w2_p = _pad2(w2, h_pad, c_pad, jnp.bfloat16)
    b2_p = _pad2(b2, 1, c_pad, jnp.float32)

    # Layer-1 projection hoisted out of the A-tiled loop.
    xw = _project(x_p, w1_p, out_dtype=jnp.bfloat16)              # [n_pad, h_pad]

    # Layer-1 aggregation with the layer-2 projection fused into the epilogue:
    #   hw = relu(A @ xw + b1) @ W2   (bf16 out; h1 never round-trips HBM).
    hw = _aggregate(a_p, xw, b1_p, w2=w2_p, out_dtype=jnp.bfloat16)  # [n_pad, c_pad]

    # TODO(synk): F.dropout(training=True) is stochastic; implemented as
    # identity (inference / eval mode) for deterministic semantics.

    # Layer-2 aggregation: out = A @ hw + b2 (accumulated directly in o_ref).
    out = _aggregate(a_p, hw, b2_p, apply_relu=False,
                     out_dtype=jnp.float32)                        # [n_pad, c_pad]

    return out[:n, :c]


def normalized_adjacency(edge_index, num_nodes):
    """Dense D^-1/2 (A + I) D^-1/2 built from edge_index [2, E] (src, dst)."""
    src, dst = edge_index[0], edge_index[1]
    a = jnp.zeros((num_nodes, num_nodes), jnp.float32)
    a = a.at[dst, src].add(1.0)                  # message src -> dst
    a = jnp.minimum(a, 1.0)                      # dedupe multi-edges
    a = jnp.maximum(a, jnp.eye(num_nodes, dtype=jnp.float32))  # self-loops
    deg = a.sum(axis=1)
    dinv = jnp.where(deg > 0, 1.0 / jnp.sqrt(deg), 0.0)
    return dinv[:, None] * a * dinv[None, :]


if __name__ == "__main__":
    # Small synthetic graph consistent with the module: N nodes, f -> h -> c.
    N, F_IN, H_DIM, C_OUT = 16, 8, 32, 4

    key = jax.random.PRNGKey(0)
    k_x, k_e, k_w1, k_w2 = jax.random.split(key, 4)

    # Node features.
    x = jax.random.normal(k_x, (N, F_IN), dtype=jnp.float32)

    # Undirected ring graph plus a few random chords, stored as edge_index.
    ring_src = jnp.arange(N, dtype=jnp.int32)
    ring_dst = (ring_src + 1) % N
    extra_src = jax.random.randint(k_e, (8,), 0, N, dtype=jnp.int32)
    extra_dst = (extra_src + 5) % N
    src = jnp.concatenate([ring_src, ring_dst, extra_src, extra_dst])
    dst = jnp.concatenate([ring_dst, ring_src, extra_dst, extra_src])
    edge_index = jnp.stack([src, dst], axis=0)  # [2, E]

    # Deterministic parameters (GCNConv: linear weight + zero bias).
    w1 = (jax.random.normal(k_w1, (F_IN, H_DIM), dtype=jnp.float32)
          * (1.0 / jnp.sqrt(F_IN)))
    b1 = jnp.zeros((1, H_DIM), dtype=jnp.float32)
    w2 = (jax.random.normal(k_w2, (H_DIM, C_OUT), dtype=jnp.float32)
          * (1.0 / jnp.sqrt(H_DIM)))
    b2 = jnp.zeros((1, C_OUT), dtype=jnp.float32)

    a_norm = normalized_adjacency(edge_index, N)

    out = gcn_forward(a_norm, x, w1, b1, w2, b2)
    out = jax.block_until_ready(out)
    assert out.shape == (N, C_OUT)

    # Reference mirroring the kernel's precision chain (bf16 inputs, f32 acc).
    a_bf = a_norm.astype(jnp.bfloat16)
    x_bf = x.astype(jnp.bfloat16)
    w1_bf = w1.astype(jnp.bfloat16)
    w2_bf = w2.astype(jnp.bfloat16)
    xw_bf = jnp.dot(x_bf, w1_bf,
                    preferred_element_type=jnp.float32).astype(jnp.bfloat16)
    h_ref = jnp.maximum(
        jnp.dot(a_bf, xw_bf, preferred_element_type=jnp.float32) + b1, 0.0)
    hw_bf = jnp.dot(h_ref.astype(jnp.bfloat16), w2_bf,
                    preferred_element_type=jnp.float32).astype(jnp.bfloat16)
    ref_mirror = jnp.dot(a_bf, hw_bf, preferred_element_type=jnp.float32) + b2
    assert jnp.allclose(out, ref_mirror, atol=2.5e-2, rtol=2.5e-2)

    # Loose sanity check against the full-f32 reference.
    h32 = jnp.maximum(a_norm @ (x @ w1) + b1, 0.0)
    ref32 = a_norm @ (h32 @ w2) + b2
    assert jnp.allclose(out, ref32, atol=1e-1, rtol=1e-1)

    print("KERNEL_OK")
</pallas_src>

<mosaic_0001>
module attributes {stable_mosaic.version = 11 : i64} {
  func.func @_project_kernel(%arg0: i32, %arg1: memref<128x8xbf16, #tpu.memory_space<vmem>>, %arg2: memref<8x128xbf16, #tpu.memory_space<vmem>>, %arg3: memref<128x128xbf16, #tpu.memory_space<vmem>>) attributes {dimension_semantics = [#tpu.dimension_semantics<parallel>], iteration_bounds = array<i64: 1>, scalar_prefetch = 0 : i64, scratch_operands = 0 : i64, tpu.core_type = #tpu.core_type<tc>, window_params = [{transform_indices = @transform_0, window_bounds = array<i64: 128, 8>}, {pipeline_mode = #tpu.pipeline_mode<synchronous>, transform_indices = @transform_1, window_bounds = array<i64: 8, 128>}, {transform_indices = @transform_2, window_bounds = array<i64: 128, 128>}]} {
    %c0 = arith.constant 0 : index
    %c0_0 = arith.constant 0 : index
    %0 = vector.load %arg1[%c0, %c0_0] : memref<128x8xbf16, #tpu.memory_space<vmem>>, vector<128x8xbf16>
    %c0_1 = arith.constant 0 : index
    %c0_2 = arith.constant 0 : index
    %1 = vector.load %arg2[%c0_1, %c0_2] : memref<8x128xbf16, #tpu.memory_space<vmem>>, vector<8x128xbf16>
    %cst = arith.constant dense<0.000000e+00> : vector<128x128xf32>
    %2 = tpu.matmul %0, %1, %cst {dimension_numbers = #tpu.dot_dimension_numbers<[1], [0], [0], [1], [0, 0, 1, 1], [], []>} : vector<128x8xbf16>, vector<8x128xbf16>, vector<128x128xf32> -> vector<128x128xf32>
    %3 = arith.truncf %2 : vector<128x128xf32> to vector<128x128xbf16>
    %c0_3 = arith.constant 0 : index
    %c0_4 = arith.constant 0 : index
    %4 = vector.load %arg3[%c0_3, %c0_4] : memref<128x128xbf16, #tpu.memory_space<vmem>>, vector<128x128xbf16>
    tpu.vector_store %arg3[%c0_3, %c0_4], %3 {strides = array<i32>} : memref<128x128xbf16, #tpu.memory_space<vmem>>, vector<128x128xbf16>,
    return
  }
  func.func @transform_0(%arg0: i32) -> (i32, i32) {
    %c0_i32 = arith.constant 0 : i32
    %c0_i32_0 = arith.constant 0 : i32
    return %arg0, %c0_i32 : i32, i32
  }
  func.func @transform_1(%arg0: i32) -> (i32, i32) {
    %c0_i32 = arith.constant 0 : i32
    %c0_i32_0 = arith.constant 0 : i32
    %c0_i32_1 = arith.constant 0 : i32
    return %c0_i32, %c0_i32_0 : i32, i32
  }
  func.func @transform_2(%arg0: i32) -> (i32, i32) {
    %c0_i32 = arith.constant 0 : i32
    %c0_i32_0 = arith.constant 0 : i32
    return %arg0, %c0_i32 : i32, i32
  }
}

</mosaic_0001>

<bundles_post_ra>
// kernel: tpu_custom_call.1
= control target key start
LH: loop header
LB: loop body
LE: loop exit
PB: predicated region body
PF: predicated region fallthrough
CT: control target
= control target key end

     0   :  { %vm95_vm0 = vcmask 1043456   ;;  %vm70_vm1 = vcmask 64512   ;;  %s518_s0 = inlined_call_operand.vmem [shape: bf16[128,8], index: 0, kind: input, shape index: {}]   ;;  %s519_s1 = inlined_call_operand.vmem [shape: bf16[8,128], index: 1, kind: input, shape index: {}]   ;;  %s520_s2 = inlined_call_operand.hbm [shape: bf16[128,128], index: 2, kind: output, shape index: {}]  }
   0x1   :  { %v29_v0 = vld [vmem:[%s519_s1] sm:$0xf]  ;;  %v423_v4 = vld [vmem:[%s518_s0 + $0x8] sm:$0xff]   ;;  %v425_v6 = vld [vmem:[%s518_s0 + $0x10] sm:$0xff]  }
   0x2   :  { %v421_v1 = vld [vmem:[%s518_s0] sm:$0xff]   ;;  %416 = vmatprep.subr.msk.bf16.mxu0 %vm95_vm0, %v29_v0  ;;  %417 = vmatprep.subr.msk.bf16.mxu1 %vm95_vm0, %v29_v0  ;;  %v97_v2 = vsel %vm95_vm0, %v29_v0, 0  ;;  %v424_v5 = vld [vmem:[%s518_s0 + $0x28] sm:$0xff]   ;;  %v426_v7 = vld [vmem:[%s518_s0 + $0x30] sm:$0xff]  }
   0x3   :  { %397 = vmatpush3.bf16.msra.mxu0 %v97_v2  ;;  %415 = vmatpush3.bf16.msra.mxu1 %v97_v2  ;;  %v422_v3 = vld [vmem:[%s518_s0 + $0x20] sm:$0xff]  }
   0x4   :  { %398 = vmatprep.mubr.msk.bf16.mxu0 %vm70_vm1, %v421_v1  ;;  %406 = vmatprep.mubr.msk.bf16.mxu1 %vm70_vm1, %v422_v3 }
   0x6   :  { %399 = vmatmul.mubr.msk.bf16.vlgmr.msra.gmra.mrb[0].mxu0 %vm70_vm1, %v423_v4  ;;  %407 = vmatmul.mubr.msk.bf16.vlgmr.msra.gmra.mrb[0].mxu1 %vm70_vm1, %v424_v5 }
   0x7   :  { %402 = vmatprep.mubr.msk.bf16.mxu0 %vm70_vm1, %v425_v6  ;;  %410 = vmatprep.mubr.msk.bf16.mxu1 %vm70_vm1, %v426_v7 }
   0x8   :  { %7 = vsyncpa [#allocation3], 0  ;;  %v427_v8 = vld [vmem:[%s518_s0 + $0x18] sm:$0xff]  }
   0x9   :  { %v428_v9 = vld [vmem:[%s518_s0 + $0x38] sm:$0xff]   ;;  %s453_s0 = smov [#allocation2]  }
   0xa   :  { %s281_s26 = sshll.u32 %s453_s0, 4  ;;  %s282_s26 = int_to_ptr.vmem [resolvable:$true] %s281_s26 }
   0xb   :  { %s429_s27 = scalar_lea.vmem %s282_s26, 1024  ;;  %p434_p1 = scmp.lt.s32.totalorder %s282_s26, %s282_s26 }
   0xc   :  { %p430_p0 = scmp.ne.s32.totalorder %s282_s26, %s429_s27  ;;  %p435_p2 = scmp.lt.s32.totalorder %s429_s27, %s429_s27 }
   0xe   :  { %403 = vmatmul.mubr.msk.bf16.gmra.mrb[4].mxu0 %vm70_vm1, %v427_v8  ;;  %411 = vmatmul.mubr.msk.bf16.gmra.mrb[4].mxu1 %vm70_vm1, %v428_v9  ;;  %p436_p3 = por %p435_p2, %p434_p1 }
  0x10   :  { %p437_p4 = pnand %p436_p3, %p430_p0 }
  0xd9   :  { %v400_v10 = vpop.f32.mrb[0].mxu0  ;;  %v408_v11 = vpop.f32.mrb[0].mxu1 }
  0xda   :  { %v133_v12 = vpop.f32.mrb[1].mxu0  ;;  %v165_v13 = vpop.f32.mrb[1].mxu1 }
  0xdb   :  { %v401_v14 = vpop.f32.mrb[2].mxu0  ;;  %v409_v16 = vpop.f32.mrb[2].mxu1 }
  0xdc   :  { %v348_v15 = vpack.c.bf16 %v401_v14, %v400_v10  ;;  %v136_v17 = vpop.f32.mrb[3].mxu0  ;;  %v368_v18 = vpack.c.bf16 %v409_v16, %v408_v11  ;;  %v168_v20 = vpop.f32.mrb[3].mxu1 }
  0xdd   :  { %v343_v19 = vpack.c.bf16 %v136_v17, %v133_v12  ;;  %v363_v21 = vpack.c.bf16 %v168_v20, %v165_v13 }
  0xde   :  { %380 = vst [vmem:[#allocation2 + $0x8] sm:$0xff] %v348_v15   ;;  %384 = vst [vmem:[#allocation2 + $0x28] sm:$0xff] %v368_v18  }
  0xdf   :  { %344 = vst [vmem:[#allocation2] sm:$0xff] %v343_v19   ;;  %383 = vst [vmem:[#allocation2 + $0x20] sm:$0xff] %v363_v21  }
  0xe1   :  { %v404_v22 = vpop.f32.mrb[4].mxu0  ;;  %v412_v23 = vpop.f32.mrb[4].mxu1 }
  0xe2   :  { %v149_v24 = vpop.f32.mrb[5].mxu0  ;;  %v181_v25 = vpop.f32.mrb[5].mxu1 }
  0xe3   :  { %v405_v26 = vpop.f32.mrb[6].mxu0  ;;  %v413_v28 = vpop.f32.mrb[6].mxu1 }
  0xe4   :  { %v358_v27 = vpack.c.bf16 %v405_v26, %v404_v22  ;;  %v152_v29 = vpop.f32.mrb[7].mxu0  ;;  %v378_v30 = vpack.c.bf16 %v413_v28, %v412_v23  ;;  %v184_v32 = vpop.f32.mrb[7].mxu1 }
  0xe5   :  { %v353_v31 = vpack.c.bf16 %v152_v29, %v149_v24  ;;  %v373_v33 = vpack.c.bf16 %v184_v32, %v181_v25 }
  0xe6   :  { %382 = vst [vmem:[#allocation2 + $0x18] sm:$0xff] %v358_v27   ;;  %386 = vst [vmem:[#allocation2 + $0x38] sm:$0xff] %v378_v30  }
  0xe7   :  { %381 = vst [vmem:[#allocation2 + $0x10] sm:$0xff] %v353_v31   ;;  %385 = vst [vmem:[#allocation2 + $0x30] sm:$0xff] %v373_v33  }
  0xe8   :  { %440 = shalt.err (!%p437_p4)
}
  0xe9   :  { %s441_s30 = scalar_lea.hbm %s520_s2, 1024 }
  0xea   :  { %p442_p5 = scmp.ne.s32.totalorder %s520_s2, %s441_s30  ;;  %p445_p6 = scmp.lt.u32.totalorder %s441_s30, %s520_s2 }
  0xec   :  { %p447_p7 = pnand %p445_p6, %p442_p5 }
  0xee   :  { %450 = shalt.err (!%p447_p7)
}
  0xef   :  { %s454_s7 = smov 64   ;;  %s455_s8 = smov 4  }
  0xf0   :  { %287 = dma.vmem_to_hbm [thread:$0]  %s282_s26, 1024, %s520_s2, [#allocation3], %s454_s7, %s454_s7, %s455_s8  }
  0xf1   :  { %451 = dma.done.wait [#allocation3], 1024  }
  0xf2   :  { %452 = vsyncadd [#allocation3], 4294966272 }
  0xf3   :  { %291 = vsyncpa [#allocation3], 1 }

</bundles_post_ra>
